<compile_context>
chip_gen: v5e
topology: v5e:2x2
jax: 0.10.0
libtpu: 0.0.40
codegen_flags: <defaults>
</compile_context>

<pallas_src>
import jax
import jax.numpy as jnp
from jax.experimental import pallas as pl
from jax.experimental.pallas import tpu as pltpu

LANE = 128      # lane width (last-dim alignment for the padded hidden dims)
SUBLANE = 16    # bf16 sublane packing (second-to-last dim alignment)
TB_MAX = 2048   # batch-tile cap (double-buffered footprint still only a few MiB)


def _round_up(n, m):
    return ((n + m - 1) // m) * m


def tasknet_kernel(x_ref, w1_ref, b1_ref, w2_ref, b2_ref, w3_ref, b3_ref, o_ref):
    # In-kernel cast of the f32 x stream to the bf16 MXU operand dtype
    # (removes the wrapper-side pad/cast pass over x).
    x = x_ref[...].astype(w1_ref.dtype)
    # fc1 + ReLU: bf16 MXU inputs, f32 accumulation, f32 epilogue (bias/ReLU).
    h1 = jnp.dot(x, w1_ref[...], preferred_element_type=jnp.float32)
    h1 = jnp.maximum(h1 + b1_ref[...], 0.0).astype(w2_ref.dtype)
    # fc2 + ReLU
    h2 = jnp.dot(h1, w2_ref[...], preferred_element_type=jnp.float32)
    h2 = jnp.maximum(h2 + b2_ref[...], 0.0).astype(w3_ref.dtype)
    # fc3 (output dim is the TRUE 2*M_t width; no padded lanes, no post-slice)
    o_ref[...] = (
        jnp.dot(h2, w3_ref[...], preferred_element_type=jnp.float32) + b3_ref[...]
    ).astype(o_ref.dtype)


def tasknet_forward(x, params, *, block_batch=None,
                    compute_dtype=jnp.bfloat16, out_dtype=jnp.float32):
    """x: [B, M_t] (any float dtype); returns [B, 2*M_t] in `out_dtype`."""
    w1, b1, w2, b2, w3, b3 = params
    B, in_dim = x.shape
    out_dim = w3.shape[1]

    # Hidden dims padded to lane multiples (zero padding is exact: padded
    # columns pass through ReLU as zeros and contribute nothing downstream).
    H1 = _round_up(w1.shape[1], LANE)   # fc1 out: 84  -> 128
    H2 = _round_up(w2.shape[1], LANE)   # fc2 out: 120 -> 128

    def pad2(a, rows, cols):
        return jnp.pad(a, ((0, rows - a.shape[0]), (0, cols - a.shape[1])))

    # Weights (tiny, VMEM-resident): bf16 for the MXU.  K (= M_t) and the final
    # output dim (= 2*M_t) stay at their true extents.
    w1p = pad2(w1, in_dim, H1).astype(compute_dtype)     # [M_t, 128]
    w2p = pad2(w2, H1, H2).astype(compute_dtype)         # [128, 128]
    w3p = pad2(w3, H2, out_dim).astype(compute_dtype)    # [128, 2*M_t]
    b1p = pad2(b1, 1, H1).astype(jnp.float32)
    b2p = pad2(b2, 1, H2).astype(jnp.float32)
    b3p = b3.astype(jnp.float32)                         # [1, 2*M_t]

    # Batch-tile selection: enough tiles to (a) respect TB_MAX and (b) give
    # each TensorCore at least one tile on multi-core parts (v7x), without
    # over-fragmenting tiny batches or padding the batch (ragged last tile is
    # handled by Pallas' masked boundary read/write).
    if block_batch is None:
        n_tiles = max(pl.cdiv(B, TB_MAX), min(2, pl.cdiv(B, SUBLANE)))
        block_batch = pl.cdiv(B, n_tiles)
    TB = _round_up(max(int(block_batch), 1), SUBLANE)
    TB = min(TB, _round_up(B, SUBLANE))
    grid = (pl.cdiv(B, TB),)

    # Matches PyTorch's x.float(); a no-op for f32 inputs.
    x = x.astype(jnp.float32)

    resident = lambda a: pl.BlockSpec(a.shape, lambda i: (0, 0))  # VMEM-resident

    # Advisory cost model for XLA's scheduler (mem-bound custom call).
    cbytes = jnp.dtype(compute_dtype).itemsize
    obytes = jnp.dtype(out_dtype).itemsize
    flops = 2 * B * (in_dim * H1 + H1 * H2 + H2 * out_dim)
    bytes_accessed = (
        B * in_dim * 4 + B * out_dim * obytes
        + (in_dim * H1 + H1 * H2 + H2 * out_dim) * cbytes
        + (H1 + H2 + out_dim) * 4
    )

    out = pl.pallas_call(
        tasknet_kernel,
        out_shape=jax.ShapeDtypeStruct((B, out_dim), out_dtype),
        grid=grid,
        in_specs=[
            pl.BlockSpec((TB, in_dim), lambda i: (i, 0)),   # x: tiled over batch
            resident(w1p), resident(b1p),
            resident(w2p), resident(b2p),
            resident(w3p), resident(b3p),
        ],
        out_specs=pl.BlockSpec((TB, out_dim), lambda i: (i, 0)),
        compiler_params=pltpu.CompilerParams(
            # "parallel" lets multi-TensorCore chips (v7x) shard batch tiles;
            # no-op on single-core v5e/v6e.  VMEM footprint (<6 MiB even at
            # TB=2048) is far below every generation's scoped default, so no
            # explicit vmem_limit_bytes is needed.
            dimension_semantics=("parallel",)),
        cost_estimate=pl.CostEstimate(
            flops=flops, transcendentals=0, bytes_accessed=bytes_accessed),
    )(x, w1p, b1p, w2p, b2p, w3p, b3p)

    return out


def init_params(key, M_t):
    """Deterministic init mimicking nn.Linear shapes.

    PyTorch nn.Linear(in, out) has weight [out, in], bias [out]; we store the
    weight transposed as [in, out] and the bias as [1, out] for the kernel.
    """
    def linear(k, fan_in, fan_out):
        kw, kb = jax.random.split(k)
        bound = 1.0 / jnp.sqrt(fan_in)
        w = jax.random.uniform(kw, (fan_in, fan_out), jnp.float32, -bound, bound)
        b = jax.random.uniform(kb, (1, fan_out), jnp.float32, -bound, bound)
        return w, b

    k1, k2, k3 = jax.random.split(key, 3)
    w1, b1 = linear(k1, M_t, 84)        # fc1
    w2, b2 = linear(k2, 84, 120)        # fc2
    w3, b3 = linear(k3, 120, 2 * M_t)   # fc3
    return (w1, b1, w2, b2, w3, b3)


def tasknet_reference_f32(x, params):
    """Pure-f32 reference (the true PyTorch taskNet math)."""
    w1, b1, w2, b2, w3, b3 = params
    xf = x.astype(jnp.float32)
    h1 = jnp.maximum(xf @ w1 + b1, 0.0)
    h2 = jnp.maximum(h1 @ w2 + b2, 0.0)
    return h2 @ w3 + b3


if __name__ == "__main__":
    M_t = 32     # task size: fc1 in-features = M_t, output = 2 * M_t
    B = 40       # small, non-aligned batch to exercise the ragged last tile

    key = jax.random.PRNGKey(0)
    kx, kp = jax.random.split(key)
    x = jax.random.normal(kx, (B, M_t), jnp.float32)
    params = init_params(kp, M_t)

    # Forced small tile -> 3-step grid with a masked ragged last tile (40 = 16+16+8).
    out = tasknet_forward(x, params, block_batch=16)
    out = jax.block_until_ready(out)
    assert out.shape == (B, 2 * M_t)

    # Default heuristic tile selection path.
    out2 = jax.block_until_ready(tasknet_forward(x, params))
    assert out2.shape == (B, 2 * M_t)

    # Check against the pure-f32 reference (bf16 MXU path -> loose-ish tolerance).
    ref = tasknet_reference_f32(x, params)
    err1 = float(jnp.max(jnp.abs(out - ref)))
    err2 = float(jnp.max(jnp.abs(out2 - ref)))
    assert err1 < 2e-2 and err2 < 2e-2, (err1, err2)

    print("KERNEL_OK")
</pallas_src>

<mosaic_0001>
module attributes {stable_mosaic.version = 11 : i64} {
  func.func @tasknet_kernel(%arg0: i32, %arg1: memref<16x32xf32, #tpu.memory_space<vmem>>, %arg2: memref<32x128xbf16, #tpu.memory_space<vmem>>, %arg3: memref<1x128xf32, #tpu.memory_space<vmem>>, %arg4: memref<128x128xbf16, #tpu.memory_space<vmem>>, %arg5: memref<1x128xf32, #tpu.memory_space<vmem>>, %arg6: memref<128x64xbf16, #tpu.memory_space<vmem>>, %arg7: memref<1x64xf32, #tpu.memory_space<vmem>>, %arg8: memref<16x64xf32, #tpu.memory_space<vmem>>) attributes {dimension_semantics = [#tpu.dimension_semantics<parallel>], iteration_bounds = array<i64: 3>, scalar_prefetch = 0 : i64, scratch_operands = 0 : i64, tpu.core_type = #tpu.core_type<tc>, window_params = [{transform_indices = @transform_0, window_bounds = array<i64: 16, 32>}, {pipeline_mode = #tpu.pipeline_mode<synchronous>, transform_indices = @transform_1, window_bounds = array<i64: 32, 128>}, {pipeline_mode = #tpu.pipeline_mode<synchronous>, transform_indices = @transform_2, window_bounds = array<i64: 1, 128>}, {pipeline_mode = #tpu.pipeline_mode<synchronous>, transform_indices = @transform_3, window_bounds = array<i64: 128, 128>}, {pipeline_mode = #tpu.pipeline_mode<synchronous>, transform_indices = @transform_4, window_bounds = array<i64: 1, 128>}, {pipeline_mode = #tpu.pipeline_mode<synchronous>, transform_indices = @transform_5, window_bounds = array<i64: 128, 64>}, {pipeline_mode = #tpu.pipeline_mode<synchronous>, transform_indices = @transform_6, window_bounds = array<i64: 1, 64>}, {transform_indices = @transform_7, window_bounds = array<i64: 16, 64>}]} {
    %c0 = arith.constant 0 : index
    %c0_0 = arith.constant 0 : index
    %0 = vector.load %arg1[%c0, %c0_0] : memref<16x32xf32, #tpu.memory_space<vmem>>, vector<16x32xf32>
    %1 = arith.truncf %0 : vector<16x32xf32> to vector<16x32xbf16>
    %c0_1 = arith.constant 0 : index
    %c0_2 = arith.constant 0 : index
    %2 = vector.load %arg2[%c0_1, %c0_2] : memref<32x128xbf16, #tpu.memory_space<vmem>>, vector<32x128xbf16>
    %cst = arith.constant dense<0.000000e+00> : vector<16x128xf32>
    %3 = tpu.matmul %1, %2, %cst {dimension_numbers = #tpu.dot_dimension_numbers<[1], [0], [0], [1], [0, 0, 1, 1], [], []>} : vector<16x32xbf16>, vector<32x128xbf16>, vector<16x128xf32> -> vector<16x128xf32>
    %c0_3 = arith.constant 0 : index
    %c0_4 = arith.constant 0 : index
    %4 = vector.load %arg3[%c0_3, %c0_4] : memref<1x128xf32, #tpu.memory_space<vmem>>, vector<1x128xf32>
    %5 = vector.broadcast %4 : vector<1x128xf32> to vector<16x128xf32>
    %6 = arith.addf %3, %5 : vector<16x128xf32>
    %cst_5 = arith.constant 0.000000e+00 : f32
    %7 = vector.broadcast %cst_5 : f32 to vector<16x128xf32>
    %8 = arith.maximumf %6, %7 : vector<16x128xf32>
    %9 = arith.truncf %8 : vector<16x128xf32> to vector<16x128xbf16>
    %c0_6 = arith.constant 0 : index
    %c0_7 = arith.constant 0 : index
    %10 = vector.load %arg4[%c0_6, %c0_7] : memref<128x128xbf16, #tpu.memory_space<vmem>>, vector<128x128xbf16>
    %cst_8 = arith.constant dense<0.000000e+00> : vector<16x128xf32>
    %11 = tpu.matmul %9, %10, %cst_8 {dimension_numbers = #tpu.dot_dimension_numbers<[1], [0], [0], [1], [0, 0, 1, 1], [], []>} : vector<16x128xbf16>, vector<128x128xbf16>, vector<16x128xf32> -> vector<16x128xf32>
    %c0_9 = arith.constant 0 : index
    %c0_10 = arith.constant 0 : index
    %12 = vector.load %arg5[%c0_9, %c0_10] : memref<1x128xf32, #tpu.memory_space<vmem>>, vector<1x128xf32>
    %13 = vector.broadcast %12 : vector<1x128xf32> to vector<16x128xf32>
    %14 = arith.addf %11, %13 : vector<16x128xf32>
    %cst_11 = arith.constant 0.000000e+00 : f32
    %15 = vector.broadcast %cst_11 : f32 to vector<16x128xf32>
    %16 = arith.maximumf %14, %15 : vector<16x128xf32>
    %17 = arith.truncf %16 : vector<16x128xf32> to vector<16x128xbf16>
    %c0_12 = arith.constant 0 : index
    %c0_13 = arith.constant 0 : index
    %18 = vector.load %arg6[%c0_12, %c0_13] : memref<128x64xbf16, #tpu.memory_space<vmem>>, vector<128x64xbf16>
    %cst_14 = arith.constant dense<0.000000e+00> : vector<16x64xf32>
    %19 = tpu.matmul %17, %18, %cst_14 {dimension_numbers = #tpu.dot_dimension_numbers<[1], [0], [0], [1], [0, 0, 1, 1], [], []>} : vector<16x128xbf16>, vector<128x64xbf16>, vector<16x64xf32> -> vector<16x64xf32>
    %c0_15 = arith.constant 0 : index
    %c0_16 = arith.constant 0 : index
    %20 = vector.load %arg7[%c0_15, %c0_16] : memref<1x64xf32, #tpu.memory_space<vmem>>, vector<1x64xf32>
    %21 = vector.broadcast %20 : vector<1x64xf32> to vector<16x64xf32>
    %22 = arith.addf %19, %21 : vector<16x64xf32>
    %c0_17 = arith.constant 0 : index
    %c0_18 = arith.constant 0 : index
    %23 = vector.load %arg8[%c0_17, %c0_18] : memref<16x64xf32, #tpu.memory_space<vmem>>, vector<16x64xf32>
    tpu.vector_store %arg8[%c0_17, %c0_18], %22 {strides = array<i32>} : memref<16x64xf32, #tpu.memory_space<vmem>>, vector<16x64xf32>,
    return
  }
  func.func @transform_0(%arg0: i32) -> (i32, i32) {
    %c0_i32 = arith.constant 0 : i32
    %c0_i32_0 = arith.constant 0 : i32
    return %arg0, %c0_i32 : i32, i32
  }
  func.func @transform_1(%arg0: i32) -> (i32, i32) {
    %c0_i32 = arith.constant 0 : i32
    %c0_i32_0 = arith.constant 0 : i32
    %c0_i32_1 = arith.constant 0 : i32
    return %c0_i32, %c0_i32_0 : i32, i32
  }
  func.func @transform_2(%arg0: i32) -> (i32, i32) {
    %c0_i32 = arith.constant 0 : i32
    %c0_i32_0 = arith.constant 0 : i32
    %c0_i32_1 = arith.constant 0 : i32
    return %c0_i32, %c0_i32_0 : i32, i32
  }
  func.func @transform_3(%arg0: i32) -> (i32, i32) {
    %c0_i32 = arith.constant 0 : i32
    %c0_i32_0 = arith.constant 0 : i32
    %c0_i32_1 = arith.constant 0 : i32
    return %c0_i32, %c0_i32_0 : i32, i32
  }
  func.func @transform_4(%arg0: i32) -> (i32, i32) {
    %c0_i32 = arith.constant 0 : i32
    %c0_i32_0 = arith.constant 0 : i32
    %c0_i32_1 = arith.constant 0 : i32
    return %c0_i32, %c0_i32_0 : i32, i32
  }
  func.func @transform_5(%arg0: i32) -> (i32, i32) {
    %c0_i32 = arith.constant 0 : i32
    %c0_i32_0 = arith.constant 0 : i32
    %c0_i32_1 = arith.constant 0 : i32
    return %c0_i32, %c0_i32_0 : i32, i32
  }
  func.func @transform_6(%arg0: i32) -> (i32, i32) {
    %c0_i32 = arith.constant 0 : i32
    %c0_i32_0 = arith.constant 0 : i32
    %c0_i32_1 = arith.constant 0 : i32
    return %c0_i32, %c0_i32_0 : i32, i32
  }
  func.func @transform_7(%arg0: i32) -> (i32, i32) {
    %c0_i32 = arith.constant 0 : i32
    %c0_i32_0 = arith.constant 0 : i32
    return %arg0, %c0_i32 : i32, i32
  }
}

</mosaic_0001>

<bundles_post_ra>
// kernel: tpu_custom_call.1
= control target key start
LH: loop header
LB: loop body
LE: loop exit
PB: predicated region body
PF: predicated region fallthrough
CT: control target
= control target key end

     0   :  { %12 = vsyncpa [#allocation3], 0  ;;  %s1053_s0 = inlined_call_operand.vmem [shape: f32[40,32], index: 0, kind: input, shape index: {}]   ;;  %s1054_s1 = inlined_call_operand.vmem [shape: bf16[32,128], index: 1, kind: input, shape index: {}]   ;;  %s1055_s2 = inlined_call_operand.vmem [shape: f32[1,128], index: 2, kind: input, shape index: {}]   ;;  %s1056_s3 = inlined_call_operand.vmem [shape: bf16[128,128], index: 3, kind: input, shape index: {}]   ;;  %s1057_s4 = inlined_call_operand.vmem [shape: f32[1,128], index: 4, kind: input, shape index: {}]   ;;  %s1058_s5 = inlined_call_operand.vmem [shape: bf16[128,64], index: 5, kind: input, shape index: {}]   ;;  %s1059_s6 = inlined_call_operand.vmem [shape: f32[1,64], index: 6, kind: input, shape index: {}]   ;;  %s1060_s7 = inlined_call_operand.hbm [shape: f32[40,64], index: 7, kind: output, shape index: {}]  }
   0x1   :  { %14 = vsyncpa [#allocation3 + $0x1], 0  ;;  %s873_s24 = smov 0   ;;  %s875_s25 = smov 0  }
   0x2   :  { %s877_s26 = smov 0   ;;  %s879_s27 = smov 0  }
   0x3 LB: > { %s894_s28 = sadd.s32 4294967295, %s828_s27   ;;  %s604_s29 = sadd.s32 4294967294, %s828_s27   ;;  %s828_s27 = sphi %s879_s27, %s1069_s27   ;;  %s824_s26 = sphi %s877_s26, %s1068_s26   ;;  %s820_s25 = sphi %s875_s25, %s1067_s25   ;;  %s816_s24 = sphi %s873_s24, %s1066_s24  }
   0x4   : > { %s898_s30 = sadd.s32 1, %s828_s27   ;;  %s179_s8 = sadd.s32 1, %s824_s26 }
   0x5   : > { %s176_s9 = ssub.s32 %s828_s27, %s898_s30  ;;  %p189_p0 = scmp.ne.s32.totalorder %s824_s26, %s820_s25 }
   0x6   : > { %p177_p1 = scmp.eq.s32.totalorder %s176_s9, 0  ;;  %p190_p2 = scmp.eq.s32.totalorder %s894_s28, 2 }
   0x7   : > { %p195_p3 = scmp.ne.s32.totalorder %s820_s25, %s816_s24  ;;  %p196_p4 = scmp.eq.s32.totalorder %s604_s29, 2 }
   0x8   : > { %s909_s10 = scalar_select %p177_p1, %s824_s26, %s179_s8  }
   0x9   : > { %p911_p5 = por %p190_p2, %p189_p0  ;;  %p915_p6 = por %p196_p4, %p195_p3 }
   0xa   : > { %p607_p7 = scmp.ge.s32.totalorder %s828_s27, 1  ;;  %p249_p8 = scmp.lt.s32.totalorder %s828_s27, 4 }
   0xc   : > { %p250_p9 = pnand %p607_p7, %p249_p8 }
   0xd   : > { %s925_s15 = sshll.u32 (!%p250_p9), %s894_s28, 1  ;;  %s282_s20 = sand.u32 (!%p250_p9), 1, %s820_s25  }
   0xe   : > { %253 = sbr.rel (%p250_p9) target bundleno = 482 (0x1e2), region = 48  ;;  %p290_p10 = scmp.lt.s32.totalorder (!%p250_p9), %s925_s15, 4 }
   0xf   : > { %s608_s21 = sshll.u32 (!%p250_p9), %s282_s20, 4  ;;  %s993_s8 = scalar_lea.sflag (!%p250_p9), [#allocation3], %s282_s20 }
  0x10   : > { %s284_s29 = scalar_lea.vmem (!%p250_p9), [#allocation2], %s608_s21 }
  0x13   : > { %v694_v0 = vld [vmem:[%s1054_s1 + $0x8] sm:$0xff]  ;;  %v702_v1 = vld [vmem:[%s1056_s3 + $0x38] sm:$0xff]  ;;  %v693_v2 = vld [vmem:[%s1054_s1] sm:$0xff]  ;;  %s291_s22 = scalar_select %p290_p10, %s925_s15, 4  ;;  %vm328_vm0 = vcmask 261120   ;;  %vm516_vm1 = vcmask 523264  }
  0x14   : > { %338 = vmatpush.bf16.msra.mxu0 %v694_v0  ;;  %417 = vmatpush.bf16.msra.mxu1 %v702_v1  ;;  %v701_v3 = vld [vmem:[%s1056_s3 + $0x30] sm:$0xff]  ;;  %v700_v4 = vld [vmem:[%s1056_s3 + $0x28] sm:$0xff]  ;;  %v699_v8 = vld [vmem:[%s1056_s3 + $0x20] sm:$0xff] }
  0x15   : > { %s610_s23 = sshll.u32 %s291_s22, 3  ;;  %v698_v9 = vld [vmem:[%s1056_s3 + $0x18] sm:$0xff]  ;;  %v697_v10 = vld [vmem:[%s1056_s3 + $0x10] sm:$0xff]  ;;  %v696_v11 = vld [vmem:[%s1056_s3 + $0x8] sm:$0xff] }
  0x16   : > { %s293_s9 = scalar_lea.vmem %s1053_s0, %s610_s23  ;;  %v695_v12 = vld [vmem:[%s1056_s3] sm:$0xff]  ;;  %v710_v13 = vld [vmem:[%s1058_s5 + $0x38] sm:$0xff]  ;;  %v709_v14 = vld [vmem:[%s1058_s5 + $0x30] sm:$0xff] }
  0x17   : > { %v305_v5 = vld [vmem:[%s293_s9] sm:$0xff]  ;;  %v306_v6 = vld [vmem:[%s293_s9 + $0x8] sm:$0xff]  ;;  %502 = vmatpush.bf16.msra.mxu2 %v710_v13  ;;  %v706_v25 = vld [vmem:[%s1058_s5 + $0x18] sm:$0xff]  ;;  %s528_s9 = ssub.s32 (%p911_p5), 5, %s925_s15 }
  0x18   : > { %339 = vmatpush.bf16.msra.mxu0 %v693_v2  ;;  %418 = vmatpush.bf16.msra.mxu1 %v701_v3  ;;  %v307_v7 = vpack.c.bf16 %v306_v6, %v305_v5  ;;  %v708_v15 = vld [vmem:[%s1058_s5 + $0x28] sm:$0xff]  ;;  %v707_v16 = vld [vmem:[%s1058_s5 + $0x20] sm:$0xff]  ;;  %v705_v26 = vld [vmem:[%s1058_s5 + $0x10] sm:$0xff]  ;;  %p529_p11 = scmp.lt.s32.totalorder (%p911_p5), %s528_s9, 2 }
  0x19   : > { %v752_v18 = vld [vmem:[%s1055_s2] ss:$0 sm:$0xff]  ;;  %v704_v27 = vld [vmem:[%s1058_s5 + $0x8] sm:$0xff] }
  0x1a   : > { %v703_v28 = vld [vmem:[%s1058_s5] sm:$0xff] }
  0x1b   : > { %619 = vmatmul.msk.bf16.vlgmr.msra.gmra.mxu0 %vm328_vm0, %v307_v7  ;;  %503 = vmatpush.bf16.msra.mxu2 %v709_v14  ;;  %v753_v30 = vld [vmem:[%s1057_s4] ss:$0 sm:$0xff] }
  0x1c   : > { %419 = vmatpush.bf16.msra.mxu1 %v700_v4  ;;  %v754_v37 = vld [vmem:[%s1059_s6] ss:$0 sm:$0xff] }
  0x1f   : > { %504 = vmatpush.bf16.msra.mxu2 %v708_v15 }
  0x20   : > { %420 = vmatpush.bf16.msra.mxu1 %v699_v8 }
  0x23   : > { %505 = vmatpush.bf16.msra.mxu2 %v707_v16 }
  0x24   : > { %421 = vmatpush.bf16.msra.mxu1 %v698_v9 }
  0x27   : > { %506 = vmatpush.bf16.msra.mxu2 %v706_v25 }
  0x28   : > { %422 = vmatpush.bf16.msra.mxu1 %v697_v10 }
  0x2b   : > { %507 = vmatpush.bf16.msra.mxu2 %v705_v26 }
  0x2c   : > { %423 = vmatpush.bf16.msra.mxu1 %v696_v11 }
  0x2f   : > { %508 = vmatpush.bf16.msra.mxu2 %v704_v27 }
  0x30   : > { %424 = vmatpush.bf16.msra.mxu1 %v695_v12 }
  0x33   : > { %509 = vmatpush.bf16.msra.mxu2 %v703_v28 }
  0x98   : > { %v341_v17 = vpop.f32.mrf.mxu0 }
  0x99   : > { %v342_v19 = vadd.f32 %v752_v18, %v341_v17 }
  0x9b   : > { %v346_v22 = vmax.f32 %v342_v19, 0.0 }
  0xa0   : > { %v343_v20 = vpop.f32.mrf.mxu0 }
  0xa1   : > { %v344_v21 = vadd.f32 %v752_v18, %v343_v20 }
  0xa3   : > { %v347_v23 = vmax.f32 %v344_v21, 0.0 }
  0xa5   : > { %v348_v24 = vpack.c.bf16 %v347_v23, %v346_v22 }
  0xa7   : > { %425 = vmatmul.bf16.vlgmr.msra.gmra.mxu1 %v348_v24 }
 0x124   : > { %v426_v29 = vpop.f32.mrf.mxu1 }
 0x125   : > { %v427_v31 = vadd.f32 %v753_v30, %v426_v29 }
 0x127   : > { %v431_v34 = vmax.f32 %v427_v31, 0.0 }
 0x12c   : > { %v428_v32 = vpop.f32.mrf.mxu1 }
 0x12d   : > { %v429_v33 = vadd.f32 %v753_v30, %v428_v32 }
 0x12f   : > { %v432_v35 = vmax.f32 %v429_v33, 0.0 }
 0x131   : > { %v433_v36 = vpack.c.bf16 %v432_v35, %v431_v34 }
 0x133   : > { %510 = vmatmul.bf16.vlgmr.msra.gmra.mxu2 %v433_v36 }
 0x1b6   : > { %v511_v38 = vpop.f32.mrf.mxu2 }
 0x1b7   : > { %v512_v39 = vadd.f32 %v754_v37, %v511_v38 }
 0x1b9   : > { %517 = vst.msk [vmem:[%s284_s29] sm:$0xff] %vm516_vm1, %v512_v39 }
 0x1bd   : > { %526 = sbr.rel (!%p911_p5) target bundleno = 482 (0x1e2), region = 52 }
 0x1be   : > { %v513_v40 = vpop.f32.mrf.mxu2 }
 0x1bf   : > { %v514_v41 = vadd.f32 %v754_v37, %v513_v40 }
 0x1c1   : > { %518 = vst.msk [vmem:[%s284_s29 + $0x8] sm:$0xff] %vm516_vm1, %v514_v41 }
 0x1c2   : > { %s1071_s9 = smov (!%p529_p11, %s528_s9), 2 }
 0x1c3   : > { %s686_s13 = sshll.u32 %s1071_s9, 3 }
 0x1c4   : > { %s532_s14 = ssub.s32 16, %s686_s13 }
 0x1c5   : > { %s533_s16 = sshll.u32 %s532_s14, 4 }
 0x1c6   : > { %534 = vsyncadd %s993_s8, %s533_s16  ;;  %p1002_p12 = scmp.ne.s32.totalorder %s686_s13, 0  ;;  %s711_s11 = sshll.u32 %s894_s28, 4 }
 0x1c7   : > { %s537_s15 = scalar_lea.hbm %s1060_s7, %s711_s11  ;;  %s539_s20 = sshll.u32 %s284_s29, 4  ;;  %s1010_s20 = int_to_ptr.vmem [resolvable:$true] %s539_s20 }
 0x1c8   : > { %s541_s21 = sshll.u32 %s537_s15, 4  ;;  %s1061_s22 = sshll.u32 %s1071_s9, 7  ;;  %s1012_s21 = int_to_ptr.hbm [resolvable:$true] %s541_s21 }
 0x1c9   : > { %s755_s23 = sshra.s32 %s1010_s20, 4  ;;  %s757_s13 = sshrl.u32 %s1061_s22, 4  ;;  %s756_s23 = int_to_ptr.vmem [resolvable:$true] %s755_s23 }
 0x1ca   : > { %s762_s14 = scalar_lea.vmem %s756_s23, %s757_s13  ;;  %s830_s28 = smov [#allocation2]  }
 0x1cb   : > { %p763_p13 = scmp.ne.s32.totalorder %s756_s23, %s762_s14  ;;  %s766_s16 = scalar_lea.vmem %s830_s28, 32 }
 0x1cc   : > { %p768_p2 = scmp.lt.s32.totalorder %s766_s16, %s762_s14 }
 0x1cd   : > { %p764_p0 = pnand %p763_p13, %p1002_p12 }
 0x1cf   : > { %p765_p1 = pneg %p764_p0 }
 0x1d1   : > { %p770_p3 = pnand %p768_p2, %p765_p1 }
 0x1d3   : > { %773 = shalt.err (!%p770_p3)
}
 0x1d4   : > { %s774_s29 = sshra.s32 %s1012_s21, 4  ;;  %s785_s15 = scalar_lea.hbm %s1060_s7, 40  ;;  %s775_s29 = int_to_ptr.hbm [resolvable:$true] %s774_s29 }
 0x1d5   : > { %s781_s11 = scalar_lea.hbm %s775_s29, %s757_s13  ;;  %p786_p8 = scmp.lt.s32.totalorder %s775_s29, %s1060_s7 }
 0x1d6   : > { %p782_p4 = scmp.ne.s32.totalorder %s775_s29, %s781_s11  ;;  %p787_p9 = scmp.lt.s32.totalorder %s785_s15, %s781_s11 }
 0x1d8   : > { %p783_p5 = pnand %p782_p4, %p1002_p12  ;;  %p788_p10 = por %p787_p9, %p786_p8 }
 0x1da   : > { %p784_p7 = pneg %p783_p5 }
 0x1dc   : > { %p789_p11 = pnand %p788_p10, %p784_p7 }
 0x1de   : > { %792 = shalt.err (!%p789_p11)
}
 0x1df   : > { %s831_s14 = smov 128   ;;  %s832_s13 = smov 8  }
 0x1e0   : > { %s1065_s28 = sshll.u32 %s1071_s9, 7 }
 0x1e1   : > { %547 = dma.vmem_to_hbm [thread:$0]  (%p1002_p12), %s1010_s20, %s1065_s28, %s1012_s21, %s993_s8, %s831_s14, %s831_s14, %s832_s13  }
 0x1e2 PF: > { %p717_p13 = scmp.ge.s32.totalorder %s828_s27, 2  ;;  %s556_s22 = sand.u32 1, %s816_s24  }
 0x1e3   : > { %s557_s16 = scalar_lea.sflag [#allocation3], %s556_s22 }
 0x1e4   : > { %p714_p0 = pnand %p717_p13, %p915_p6 }
 0x1e6   : > { %p715_p1 = pneg %p714_p0 }
 0x1e8   : > { %811 = dma.done.wait (%p715_p1), %s557_s16, 256  }
 0x1e9   : > { %813 = vsyncadd (%p715_p1), %s557_s16, 4294967040  ;;  %p17_p2 = scmp.ge.s32.totalorder %s898_s30, 5   ;;  %s1066_s24 = smov %s820_s25 }
 0x1ea   : > { %s1067_s25 = smov %s824_s26  ;;  %s1068_s26 = smov %s909_s10 }
 0x1eb   : > { %s1069_s27 = smov %s898_s30  ;;  %19 = sbr.rel (!%p17_p2) target bundleno = 3 (0x3), region = 83 }
 0x1f0   :  { %563 = vsyncpa [#allocation3], 1 }
 0x1f1   :  { %565 = vsyncpa [#allocation3 + $0x1], 1 }

</bundles_post_ra>
